<compile_context>
chip_gen: v7x
topology: tpu7x:2x2x1
jax: 0.10.0
libtpu: 0.0.40
codegen_flags: <defaults>
</compile_context>

<pallas_src>
import numpy as np
import jax
import jax.numpy as jnp
from jax.experimental import pallas as pl
from jax.experimental.pallas import tpu as pltpu

EMBED_DIM = 64      # embedding_dim
HIDDEN_DIM = 256    # hidden_layer_dim


def _round_up(x, m):
    return ((x + m - 1) // m) * m


def _qfunc_kernel(x_ref, wf_ref, bf_ref, w1_ref, b1_ref, w2_ref, b2_ref,
                  w3_ref, b3_ref, out_ref):
    """(tb, K) -> 3x ReLU-MLP(256) -> (tb, 128).  bias/ReLU in f32; dot
    operands cast to the weight dtype (bf16 fast path, f32 exact path)."""
    f32 = jnp.float32
    wdt = wf_ref.dtype                      # bf16 or f32
    h = jnp.dot(x_ref[...].astype(wdt), wf_ref[...],
                preferred_element_type=f32)
    h = jnp.maximum(h + bf_ref[...], 0.0)
    h = jnp.dot(h.astype(wdt), w1_ref[...], preferred_element_type=f32)
    h = jnp.maximum(h + b1_ref[...], 0.0)
    h = jnp.dot(h.astype(wdt), w2_ref[...], preferred_element_type=f32)
    h = jnp.maximum(h + b2_ref[...], 0.0)
    out_ref[...] = (jnp.dot(h.astype(wdt), w3_ref[...],
                            preferred_element_type=f32) + b3_ref[...])


def _linear_init(key, fan_in, fan_out):
    # PyTorch nn.Linear default init (uniform bound 1/sqrt(fan_in)).
    kw, kb = jax.random.split(key)
    bound = 1.0 / float(np.sqrt(fan_in))
    w = jax.random.uniform(kw, (fan_in, fan_out), jnp.float32, -bound, bound)
    b = jax.random.uniform(kb, (1, fan_out), jnp.float32, -bound, bound)
    return w, b


def init_params(key, last_time_shot_type_dim, hit_xy_dim, shot_type_dim,
                hidden_layer_dim=HIDDEN_DIM, embedding_dim=EMBED_DIM):
    ks = jax.random.split(key, 6)
    w_shot, b_shot = _linear_init(ks[0], last_time_shot_type_dim, embedding_dim)
    w_xy, b_xy = _linear_init(ks[1], hit_xy_dim, embedding_dim)
    w0, b0 = _linear_init(ks[2], embedding_dim * 6, hidden_layer_dim)
    w1, b1 = _linear_init(ks[3], hidden_layer_dim, hidden_layer_dim)
    w2, b2 = _linear_init(ks[4], hidden_layer_dim, hidden_layer_dim)
    # last layer: xavier_uniform with gain 0.01, bias = 0 (init_module_weights)
    bound = 0.01 * float(np.sqrt(6.0 / (hidden_layer_dim + shot_type_dim)))
    w3 = jax.random.uniform(ks[5], (hidden_layer_dim, shot_type_dim),
                            jnp.float32, -bound, bound)
    b3 = jnp.zeros((1, shot_type_dim), jnp.float32)
    return dict(w_shot=w_shot, b_shot=b_shot, w_xy=w_xy, b_xy=b_xy,
                w0=w0, b0=b0, w1=w1, b1=b1, w2=w2, b2=b2, w3=w3, b3=b3)


def fold_params(params, *, use_bf16=True):
    """Fold the linear embedding stage into W0 and pre-pad/cast the weights.

    W_fold = blockdiag(w_shot, w_xy x5) @ w0, b_fold = [b_shot, b_xy x5]@w0+b0.
    Folding is done in f32 at HIGHEST precision; storage dtype of the matmul
    weights is bf16 on the fast path, f32 otherwise.  Biases stay f32.
    Call once per parameter set and reuse across forward calls.
    """
    hi = jax.lax.Precision.HIGHEST
    E = params["w_shot"].shape[1]
    w0 = params["w0"]

    parts_w = [jnp.dot(params["w_shot"], w0[0:E, :], precision=hi)]
    b_fold = jnp.dot(params["b_shot"], w0[0:E, :], precision=hi) + params["b0"]
    for i in range(1, 6):
        chunk = w0[i * E:(i + 1) * E, :]
        parts_w.append(jnp.dot(params["w_xy"], chunk, precision=hi))
        b_fold = b_fold + jnp.dot(params["b_xy"], chunk, precision=hi)

    w_fold = jnp.concatenate(parts_w, axis=0)          # (d_shot + 5*d_xy, H)
    d_in = w_fold.shape[0]
    in_pad = max(32, _round_up(d_in, 32))              # 20 -> 32 lanes
    w_fold = jnp.pad(w_fold, ((0, in_pad - d_in), (0, 0)))

    n_out = params["w3"].shape[1]
    out_pad = max(128, _round_up(n_out, 128))          # lane-dense output
    w3_pad = jnp.pad(params["w3"], ((0, 0), (0, out_pad - n_out)))
    b3_pad = jnp.pad(params["b3"], ((0, 0), (0, out_pad - n_out)))

    wdt = jnp.bfloat16 if use_bf16 else jnp.float32
    return dict(w_fold=w_fold.astype(wdt), b_fold=b_fold.astype(jnp.float32),
                w1=params["w1"].astype(wdt), b1=params["b1"],
                w2=params["w2"].astype(wdt), b2=params["b2"],
                w3_pad=w3_pad.astype(wdt), b3_pad=b3_pad,
                d_in=d_in, in_pad=in_pad, n_out=n_out, out_pad=out_pad)


def _choose_tile(n, block_batch):
    """Batch tile: multiple of 8 sublanes; >=2 grid steps when n > 64 so both
    v7x TensorCores are used (grid axis is 'parallel')."""
    if n <= 64:
        return max(8, _round_up(n, 8))
    return max(8, min(block_batch, _round_up(-(-n // 2), 8)))


def fully_connected_q_forward(params, last_time_shot_type, hit_xy,
                              player_location_xy, opponent_location_xy,
                              shot_type, landing_xy, move_xy, *,
                              block_batch=1024, folded=None, use_bf16=True,
                              x_buffers=2):
    del shot_type  # unused in the reference forward pass
    if folded is None:
        folded = fold_params(params, use_bf16=use_bf16)

    # extend_and_repeat branch (glue, plain JAX)
    if landing_xy.ndim == 3 and last_time_shot_type.ndim == 2:
        r = landing_xy.shape[1]
        rep = lambda t: jnp.repeat(t[:, None, :], r, axis=1)
        last_time_shot_type = rep(last_time_shot_type)
        hit_xy = rep(hit_xy)
        player_location_xy = rep(player_location_xy)
        opponent_location_xy = rep(opponent_location_xy)

    out_leading = landing_xy.shape[:-1]
    n_out = folded["n_out"]

    flat = lambda t: t.reshape(-1, t.shape[-1]).astype(jnp.float32)
    # one concatenated input stream: [shot | hit | ploc | oloc | land | move]
    x = jnp.concatenate(
        [flat(t) for t in (last_time_shot_type, hit_xy, player_location_xy,
                           opponent_location_xy, landing_xy, move_xy)],
        axis=-1)
    n, d_in = x.shape
    assert d_in == folded["d_in"], (d_in, folded["d_in"])

    if n == 0:  # empty batch guard
        return jnp.zeros((*out_leading, n_out), jnp.float32)

    in_pad, out_pad = folded["in_pad"], folded["out_pad"]
    # zero-pad feature dim (matching w_fold rows are zero)
    x = jnp.pad(x, ((0, 0), (0, in_pad - d_in)))

    tb = _choose_tile(n, block_batch)
    n_pad = (-n) % tb
    if n_pad:
        x = jnp.pad(x, ((0, n_pad), (0, 0)))
    n_tot = n + n_pad

    weight_args = [folded["w_fold"], folded["b_fold"],
                   folded["w1"], folded["b1"],
                   folded["w2"], folded["b2"],
                   folded["w3_pad"], folded["b3_pad"]]
    full_spec = lambda a: pl.BlockSpec(a.shape, lambda i: (0,) * a.ndim)

    if x_buffers != 2:
        # deeper buffering of the only streaming input (use if xprof shows
        # exposed input DMA); weights are grid-invariant and stay at default.
        x_spec = pl.BlockSpec((tb, in_pad), lambda i: (i, 0),
                              pipeline_mode=pl.Buffered(x_buffers))
    else:
        x_spec = pl.BlockSpec((tb, in_pad), lambda i: (i, 0))

    cp_kwargs = dict(dimension_semantics=("parallel",))
    if tb >= 2048:
        # v5e default scoped-VMEM limit is 16 MiB; large tiles need headroom.
        cp_kwargs["vmem_limit_bytes"] = 64 * 1024 * 1024

    out = pl.pallas_call(
        _qfunc_kernel,
        out_shape=jax.ShapeDtypeStruct((n_tot, out_pad), jnp.float32),
        grid=(n_tot // tb,),
        in_specs=[x_spec] + [full_spec(a) for a in weight_args],
        out_specs=pl.BlockSpec((tb, out_pad), lambda i: (i, 0)),
        compiler_params=pltpu.CompilerParams(**cp_kwargs),
    )(x, *weight_args)

    out = out[:n, :n_out]
    return out.reshape(*out_leading, n_out)


def reference_forward(params, last_time_shot_type, hit_xy, player_location_xy,
                      opponent_location_xy, shot_type, landing_xy, move_xy):
    del shot_type
    hi = jax.lax.Precision.HIGHEST
    dot = lambda a, b: jnp.dot(a, b, precision=hi)
    if landing_xy.ndim == 3 and last_time_shot_type.ndim == 2:
        r = landing_xy.shape[1]
        rep = lambda t: jnp.repeat(t[:, None, :], r, axis=1)
        last_time_shot_type = rep(last_time_shot_type)
        hit_xy = rep(hit_xy)
        player_location_xy = rep(player_location_xy)
        opponent_location_xy = rep(opponent_location_xy)
    emb_s = dot(last_time_shot_type, params["w_shot"]) + params["b_shot"]
    embs = [emb_s] + [dot(t, params["w_xy"]) + params["b_xy"]
                      for t in (hit_xy, player_location_xy,
                                opponent_location_xy, landing_xy, move_xy)]
    x = jnp.concatenate(embs, axis=-1)
    h = jax.nn.relu(dot(x, params["w0"]) + params["b0"])
    h = jax.nn.relu(dot(h, params["w1"]) + params["b1"])
    h = jax.nn.relu(dot(h, params["w2"]) + params["b2"])
    return dot(h, params["w3"]) + params["b3"]


if __name__ == "__main__":
    key = jax.random.PRNGKey(0)
    B = 16
    last_time_shot_type_dim, xy_dim, shot_type_dim = 10, 2, 10

    kparam, k0, k1, k2, k3, k4, k5, k6 = jax.random.split(key, 8)
    params = init_params(kparam, last_time_shot_type_dim, xy_dim, shot_type_dim)
    folded_bf16 = fold_params(params, use_bf16=True)    # precompute once
    folded_f32 = fold_params(params, use_bf16=False)

    last_time_shot_type = jax.random.normal(k0, (B, last_time_shot_type_dim),
                                            jnp.float32)
    hit_xy = jax.random.normal(k1, (B, xy_dim), jnp.float32)
    player_location_xy = jax.random.normal(k2, (B, xy_dim), jnp.float32)
    opponent_location_xy = jax.random.normal(k3, (B, xy_dim), jnp.float32)
    shot_type = jax.random.normal(k4, (B, shot_type_dim), jnp.float32)  # unused
    landing_xy = jax.random.normal(k5, (B, xy_dim), jnp.float32)
    move_xy = jax.random.normal(k6, (B, xy_dim), jnp.float32)

    args = (last_time_shot_type, hit_xy, player_location_xy,
            opponent_location_xy, shot_type, landing_xy, move_xy)
    q_ref = reference_forward(params, *args)

    # 2-D path, bf16 fast path (default)
    q_bf16 = fully_connected_q_forward(params, *args, folded=folded_bf16)
    q_bf16 = jax.block_until_ready(q_bf16)
    assert q_bf16.shape == (B, shot_type_dim), q_bf16.shape
    np.testing.assert_allclose(np.asarray(q_bf16), np.asarray(q_ref),
                               rtol=5e-2, atol=5e-3)

    # 2-D path, exact f32 path (tight tolerance)
    q_f32 = fully_connected_q_forward(params, *args, folded=folded_f32,
                                      use_bf16=False)
    q_f32 = jax.block_until_ready(q_f32)
    np.testing.assert_allclose(np.asarray(q_f32), np.asarray(q_ref),
                               rtol=1e-4, atol=1e-4)

    # 3-D repeat path (extend_and_repeat branch), bf16 fast path
    R = 3
    kl, km = jax.random.split(jax.random.PRNGKey(1))
    landing_xy3 = jax.random.normal(kl, (B, R, xy_dim), jnp.float32)
    move_xy3 = jax.random.normal(km, (B, R, xy_dim), jnp.float32)
    args3 = (last_time_shot_type, hit_xy, player_location_xy,
             opponent_location_xy, shot_type, landing_xy3, move_xy3)
    q3 = fully_connected_q_forward(params, *args3, folded=folded_bf16)
    q3 = jax.block_until_ready(q3)
    q3_ref = reference_forward(params, *args3)
    assert q3.shape == (B, R, shot_type_dim), q3.shape
    np.testing.assert_allclose(np.asarray(q3), np.asarray(q3_ref),
                               rtol=5e-2, atol=5e-3)

    print("KERNEL_OK")
</pallas_src>

<mosaic_0001>
module attributes {stable_mosaic.version = 11 : i64} {
  func.func @_qfunc_kernel(%arg0: i32, %arg1: memref<16x32xf32, #tpu.memory_space<vmem>>, %arg2: memref<32x256xbf16, #tpu.memory_space<vmem>>, %arg3: memref<1x256xf32, #tpu.memory_space<vmem>>, %arg4: memref<256x256xbf16, #tpu.memory_space<vmem>>, %arg5: memref<1x256xf32, #tpu.memory_space<vmem>>, %arg6: memref<256x256xbf16, #tpu.memory_space<vmem>>, %arg7: memref<1x256xf32, #tpu.memory_space<vmem>>, %arg8: memref<256x128xbf16, #tpu.memory_space<vmem>>, %arg9: memref<1x128xf32, #tpu.memory_space<vmem>>, %arg10: memref<16x128xf32, #tpu.memory_space<vmem>>) attributes {dimension_semantics = [#tpu.dimension_semantics<parallel>], iteration_bounds = array<i64: 1>, scalar_prefetch = 0 : i64, scratch_operands = 0 : i64, tpu.core_type = #tpu.core_type<tc>, window_params = [{transform_indices = @transform_0, window_bounds = array<i64: 16, 32>}, {pipeline_mode = #tpu.pipeline_mode<synchronous>, transform_indices = @transform_1, window_bounds = array<i64: 32, 256>}, {pipeline_mode = #tpu.pipeline_mode<synchronous>, transform_indices = @transform_2, window_bounds = array<i64: 1, 256>}, {pipeline_mode = #tpu.pipeline_mode<synchronous>, transform_indices = @transform_3, window_bounds = array<i64: 256, 256>}, {pipeline_mode = #tpu.pipeline_mode<synchronous>, transform_indices = @transform_4, window_bounds = array<i64: 1, 256>}, {pipeline_mode = #tpu.pipeline_mode<synchronous>, transform_indices = @transform_5, window_bounds = array<i64: 256, 256>}, {pipeline_mode = #tpu.pipeline_mode<synchronous>, transform_indices = @transform_6, window_bounds = array<i64: 1, 256>}, {pipeline_mode = #tpu.pipeline_mode<synchronous>, transform_indices = @transform_7, window_bounds = array<i64: 256, 128>}, {pipeline_mode = #tpu.pipeline_mode<synchronous>, transform_indices = @transform_8, window_bounds = array<i64: 1, 128>}, {transform_indices = @transform_9, window_bounds = array<i64: 16, 128>}]} {
    %c0 = arith.constant 0 : index
    %c0_0 = arith.constant 0 : index
    %0 = vector.load %arg1[%c0, %c0_0] : memref<16x32xf32, #tpu.memory_space<vmem>>, vector<16x32xf32>
    %1 = arith.truncf %0 : vector<16x32xf32> to vector<16x32xbf16>
    %c0_1 = arith.constant 0 : index
    %c0_2 = arith.constant 0 : index
    %2 = vector.load %arg2[%c0_1, %c0_2] : memref<32x256xbf16, #tpu.memory_space<vmem>>, vector<32x256xbf16>
    %cst = arith.constant dense<0.000000e+00> : vector<16x256xf32>
    %3 = tpu.matmul %1, %2, %cst {dimension_numbers = #tpu.dot_dimension_numbers<[1], [0], [0], [1], [0, 0, 1, 1], [], []>} : vector<16x32xbf16>, vector<32x256xbf16>, vector<16x256xf32> -> vector<16x256xf32>
    %c0_3 = arith.constant 0 : index
    %c0_4 = arith.constant 0 : index
    %4 = vector.load %arg3[%c0_3, %c0_4] : memref<1x256xf32, #tpu.memory_space<vmem>>, vector<1x256xf32>
    %5 = vector.broadcast %4 : vector<1x256xf32> to vector<16x256xf32>
    %6 = arith.addf %3, %5 : vector<16x256xf32>
    %cst_5 = arith.constant 0.000000e+00 : f32
    %7 = vector.broadcast %cst_5 : f32 to vector<16x256xf32>
    %8 = arith.maximumf %6, %7 : vector<16x256xf32>
    %9 = arith.truncf %8 : vector<16x256xf32> to vector<16x256xbf16>
    %c0_6 = arith.constant 0 : index
    %c0_7 = arith.constant 0 : index
    %10 = vector.load %arg4[%c0_6, %c0_7] : memref<256x256xbf16, #tpu.memory_space<vmem>>, vector<256x256xbf16>
    %cst_8 = arith.constant dense<0.000000e+00> : vector<16x256xf32>
    %11 = tpu.matmul %9, %10, %cst_8 {dimension_numbers = #tpu.dot_dimension_numbers<[1], [0], [0], [1], [0, 0, 1, 1], [], []>} : vector<16x256xbf16>, vector<256x256xbf16>, vector<16x256xf32> -> vector<16x256xf32>
    %c0_9 = arith.constant 0 : index
    %c0_10 = arith.constant 0 : index
    %12 = vector.load %arg5[%c0_9, %c0_10] : memref<1x256xf32, #tpu.memory_space<vmem>>, vector<1x256xf32>
    %13 = vector.broadcast %12 : vector<1x256xf32> to vector<16x256xf32>
    %14 = arith.addf %11, %13 : vector<16x256xf32>
    %cst_11 = arith.constant 0.000000e+00 : f32
    %15 = vector.broadcast %cst_11 : f32 to vector<16x256xf32>
    %16 = arith.maximumf %14, %15 : vector<16x256xf32>
    %17 = arith.truncf %16 : vector<16x256xf32> to vector<16x256xbf16>
    %c0_12 = arith.constant 0 : index
    %c0_13 = arith.constant 0 : index
    %18 = vector.load %arg6[%c0_12, %c0_13] : memref<256x256xbf16, #tpu.memory_space<vmem>>, vector<256x256xbf16>
    %cst_14 = arith.constant dense<0.000000e+00> : vector<16x256xf32>
    %19 = tpu.matmul %17, %18, %cst_14 {dimension_numbers = #tpu.dot_dimension_numbers<[1], [0], [0], [1], [0, 0, 1, 1], [], []>} : vector<16x256xbf16>, vector<256x256xbf16>, vector<16x256xf32> -> vector<16x256xf32>
    %c0_15 = arith.constant 0 : index
    %c0_16 = arith.constant 0 : index
    %20 = vector.load %arg7[%c0_15, %c0_16] : memref<1x256xf32, #tpu.memory_space<vmem>>, vector<1x256xf32>
    %21 = vector.broadcast %20 : vector<1x256xf32> to vector<16x256xf32>
    %22 = arith.addf %19, %21 : vector<16x256xf32>
    %cst_17 = arith.constant 0.000000e+00 : f32
    %23 = vector.broadcast %cst_17 : f32 to vector<16x256xf32>
    %24 = arith.maximumf %22, %23 : vector<16x256xf32>
    %25 = arith.truncf %24 : vector<16x256xf32> to vector<16x256xbf16>
    %c0_18 = arith.constant 0 : index
    %c0_19 = arith.constant 0 : index
    %26 = vector.load %arg8[%c0_18, %c0_19] : memref<256x128xbf16, #tpu.memory_space<vmem>>, vector<256x128xbf16>
    %cst_20 = arith.constant dense<0.000000e+00> : vector<16x128xf32>
    %27 = tpu.matmul %25, %26, %cst_20 {dimension_numbers = #tpu.dot_dimension_numbers<[1], [0], [0], [1], [0, 0, 1, 1], [], []>} : vector<16x256xbf16>, vector<256x128xbf16>, vector<16x128xf32> -> vector<16x128xf32>
    %c0_21 = arith.constant 0 : index
    %c0_22 = arith.constant 0 : index
    %28 = vector.load %arg9[%c0_21, %c0_22] : memref<1x128xf32, #tpu.memory_space<vmem>>, vector<1x128xf32>
    %29 = vector.broadcast %28 : vector<1x128xf32> to vector<16x128xf32>
    %30 = arith.addf %27, %29 : vector<16x128xf32>
    %c0_23 = arith.constant 0 : index
    %c0_24 = arith.constant 0 : index
    %31 = vector.load %arg10[%c0_23, %c0_24] : memref<16x128xf32, #tpu.memory_space<vmem>>, vector<16x128xf32>
    tpu.vector_store %arg10[%c0_23, %c0_24], %30 {strides = array<i32>} : memref<16x128xf32, #tpu.memory_space<vmem>>, vector<16x128xf32>,
    return
  }
  func.func @transform_0(%arg0: i32) -> (i32, i32) {
    %c0_i32 = arith.constant 0 : i32
    %c0_i32_0 = arith.constant 0 : i32
    return %arg0, %c0_i32 : i32, i32
  }
  func.func @transform_1(%arg0: i32) -> (i32, i32) {
    %c0_i32 = arith.constant 0 : i32
    %c0_i32_0 = arith.constant 0 : i32
    %c0_i32_1 = arith.constant 0 : i32
    return %c0_i32, %c0_i32_0 : i32, i32
  }
  func.func @transform_2(%arg0: i32) -> (i32, i32) {
    %c0_i32 = arith.constant 0 : i32
    %c0_i32_0 = arith.constant 0 : i32
    %c0_i32_1 = arith.constant 0 : i32
    return %c0_i32, %c0_i32_0 : i32, i32
  }
  func.func @transform_3(%arg0: i32) -> (i32, i32) {
    %c0_i32 = arith.constant 0 : i32
    %c0_i32_0 = arith.constant 0 : i32
    %c0_i32_1 = arith.constant 0 : i32
    return %c0_i32, %c0_i32_0 : i32, i32
  }
  func.func @transform_4(%arg0: i32) -> (i32, i32) {
    %c0_i32 = arith.constant 0 : i32
    %c0_i32_0 = arith.constant 0 : i32
    %c0_i32_1 = arith.constant 0 : i32
    return %c0_i32, %c0_i32_0 : i32, i32
  }
  func.func @transform_5(%arg0: i32) -> (i32, i32) {
    %c0_i32 = arith.constant 0 : i32
    %c0_i32_0 = arith.constant 0 : i32
    %c0_i32_1 = arith.constant 0 : i32
    return %c0_i32, %c0_i32_0 : i32, i32
  }
  func.func @transform_6(%arg0: i32) -> (i32, i32) {
    %c0_i32 = arith.constant 0 : i32
    %c0_i32_0 = arith.constant 0 : i32
    %c0_i32_1 = arith.constant 0 : i32
    return %c0_i32, %c0_i32_0 : i32, i32
  }
  func.func @transform_7(%arg0: i32) -> (i32, i32) {
    %c0_i32 = arith.constant 0 : i32
    %c0_i32_0 = arith.constant 0 : i32
    %c0_i32_1 = arith.constant 0 : i32
    return %c0_i32, %c0_i32_0 : i32, i32
  }
  func.func @transform_8(%arg0: i32) -> (i32, i32) {
    %c0_i32 = arith.constant 0 : i32
    %c0_i32_0 = arith.constant 0 : i32
    %c0_i32_1 = arith.constant 0 : i32
    return %c0_i32, %c0_i32_0 : i32, i32
  }
  func.func @transform_9(%arg0: i32) -> (i32, i32) {
    %c0_i32 = arith.constant 0 : i32
    %c0_i32_0 = arith.constant 0 : i32
    return %arg0, %c0_i32 : i32, i32
  }
}

</mosaic_0001>

<bundles_post_ra>
// kernel: tpu_custom_call.1
= control target key start
LH: loop header
LB: loop body
LE: loop exit
PB: predicated region body
PF: predicated region fallthrough
CT: control target
= control target key end

     0   :  { %14 = vsyncpa [#allocation3], 0  ;;  %s1458_s0 = inlined_call_operand.hbm [shape: f32[16,32], index: 0, kind: input, shape index: {}]   ;;  %s1459_s1 = inlined_call_operand.hbm [shape: bf16[32,256], index: 1, kind: input, shape index: {}]   ;;  %s1460_s2 = inlined_call_operand.vmem [shape: f32[1,256], index: 2, kind: input, shape index: {}]   ;;  %s1461_s3 = inlined_call_operand.hbm [shape: bf16[256,256], index: 3, kind: input, shape index: {}]   ;;  %s1462_s4 = inlined_call_operand.vmem [shape: f32[1,256], index: 4, kind: input, shape index: {}]   ;;  %s1463_s5 = inlined_call_operand.hbm [shape: bf16[256,256], index: 5, kind: input, shape index: {}]   ;;  %s1464_s6 = inlined_call_operand.vmem [shape: f32[1,256], index: 6, kind: input, shape index: {}]   ;;  %s1465_s7 = inlined_call_operand.hbm [shape: bf16[256,128], index: 7, kind: input, shape index: {}]   ;;  %s1466_s8 = inlined_call_operand.vmem [shape: f32[1,128], index: 8, kind: input, shape index: {}]   ;;  %s1467_s9 = inlined_call_operand.hbm [shape: f32[16,128], index: 9, kind: output, shape index: {}]  }
   0x1   :  { %15 = vsyncpa [#allocation6], 0 }
   0x2   :  { %16 = vsyncpa [#allocation9], 0 }
   0x3   :  { %17 = vsyncpa [#allocation4], 0  ;;  %s1274_s30 = smov [#allocation5]   ;;  %s1275_s11 = smov [#allocation8]  }
   0x4   :  { %s35_s10 = sshll.u32 %s1274_s30, 4  ;;  %s63_s12 = sshll.u32 %s1275_s11, 4  ;;  %s36_s10 = int_to_ptr.vmem [resolvable:$true] %s35_s10  ;;  %s1335_s12 = int_to_ptr.vmem [resolvable:$true] %s63_s12 }
   0x5   :  { %s1134_s15 = scalar_lea.hbm %s1459_s1, 512 }
   0x6   :  { %p1135_p0 = scmp.ne.s32.totalorder %s1459_s1, %s1134_s15  ;;  %p1138_p1 = scmp.lt.u32.totalorder %s1134_s15, %s1459_s1 }
   0x8   :  { %p1140_p2 = pnand %p1138_p1, %p1135_p0 }
   0xa   :  { %1143 = shalt.err (!%p1140_p2)
}
   0xb   :  { %s1144_s20 = scalar_lea.vmem %s36_s10, 512  ;;  %p1149_p4 = scmp.lt.s32.totalorder %s36_s10, %s36_s10 }
   0xc   :  { %p1145_p3 = scmp.ne.s32.totalorder %s36_s10, %s1144_s20  ;;  %p1150_p5 = scmp.lt.s32.totalorder %s1144_s20, %s1144_s20 }
   0xe   :  { %p1151_p6 = por %p1150_p5, %p1149_p4 }
  0x10   :  { %p1152_p7 = pnand %p1151_p6, %p1145_p3 }
  0x12   :  { %1155 = shalt.err (!%p1152_p7)
}
  0x13   :  { %s1276_s21 = smov 128   ;;  %s1277_s22 = smov 8  }
  0x14   :  { %41 = dma.hbm_to_vmem [thread:$0]  %s1459_s1, 512, %s36_s10, [#allocation6], %s1276_s21, %s1276_s21, %s1277_s22  }
  0x15   :  { %s1156_s27 = scalar_lea.hbm %s1463_s5, 4096 }
  0x16   :  { %p1157_p8 = scmp.ne.s32.totalorder %s1463_s5, %s1156_s27  ;;  %p1160_p9 = scmp.lt.u32.totalorder %s1156_s27, %s1463_s5 }
  0x18   :  { %p1162_p10 = pnand %p1160_p9, %p1157_p8 }
  0x1a   :  { %1165 = shalt.err (!%p1162_p10)
}
  0x1b   :  { %s1166_s13 = scalar_lea.vmem %s1335_s12, 4096  ;;  %p1171_p12 = scmp.lt.s32.totalorder %s1335_s12, %s1335_s12 }
  0x1c   :  { %p1167_p11 = scmp.ne.s32.totalorder %s1335_s12, %s1166_s13  ;;  %p1172_p13 = scmp.lt.s32.totalorder %s1166_s13, %s1166_s13 }
  0x1e   :  { %p1173_p0 = por %p1172_p13, %p1171_p12 }
  0x20   :  { %p1174_p1 = pnand %p1173_p0, %p1167_p11 }
  0x22   :  { %1177 = shalt.err (!%p1174_p1)
}
  0x23   :  { %69 = dma.hbm_to_vmem [thread:$0]  %s1463_s5, 4096, %s1335_s12, [#allocation9], %s1276_s21, %s1276_s21, %s1277_s22  }
  0x24   :  { %s1278_s14 = smov [#allocation2]   ;;  %s1279_s16 = smov [#allocation7]  }
  0x25   :  { %s23_s15 = sshll.u32 %s1278_s14, 4  ;;  %s49_s17 = sshll.u32 %s1279_s16, 4  ;;  %s24_s15 = int_to_ptr.vmem [resolvable:$true] %s23_s15  ;;  %s1372_s17 = int_to_ptr.vmem [resolvable:$true] %s49_s17 }
  0x26   :  { %s1178_s20 = scalar_lea.hbm %s1458_s0, 256 }
  0x27   :  { %p1179_p2 = scmp.ne.s32.totalorder %s1458_s0, %s1178_s20  ;;  %p1182_p3 = scmp.lt.u32.totalorder %s1178_s20, %s1458_s0 }
  0x29   :  { %p1184_p4 = pnand %p1182_p3, %p1179_p2 }
  0x2b   :  { %1187 = shalt.err (!%p1184_p4)
}
  0x2c   :  { %s1188_s5 = scalar_lea.vmem %s24_s15, 256  ;;  %p1193_p6 = scmp.lt.s32.totalorder %s24_s15, %s24_s15 }
  0x2d   :  { %p1189_p5 = scmp.ne.s32.totalorder %s24_s15, %s1188_s5  ;;  %p1194_p7 = scmp.lt.s32.totalorder %s1188_s5, %s1188_s5 }
  0x2f   :  { %p1195_p8 = por %p1194_p7, %p1193_p6 }
  0x31   :  { %p1196_p9 = pnand %p1195_p8, %p1189_p5 }
  0x33   :  { %1199 = shalt.err (!%p1196_p9)
}
  0x34   :  { %29 = dma.hbm_to_vmem [thread:$0]  %s1458_s0, 256, %s24_s15, [#allocation3], %s1276_s21, %s1276_s21, %s1277_s22  }
  0x35   :  { %s1200_s30 = scalar_lea.hbm %s1461_s3, 4096 }
  0x36   :  { %p1201_p10 = scmp.ne.s32.totalorder %s1461_s3, %s1200_s30  ;;  %p1204_p11 = scmp.lt.u32.totalorder %s1200_s30, %s1461_s3 }
  0x38   :  { %p1206_p12 = pnand %p1204_p11, %p1201_p10 }
  0x3a   :  { %1209 = shalt.err (!%p1206_p12)
}
  0x3b   :  { %s1210_s14 = scalar_lea.vmem %s1372_s17, 4096  ;;  %p1215_p0 = scmp.lt.s32.totalorder %s1372_s17, %s1372_s17 }
  0x3c   :  { %p1211_p13 = scmp.ne.s32.totalorder %s1372_s17, %s1210_s14  ;;  %p1216_p1 = scmp.lt.s32.totalorder %s1210_s14, %s1210_s14 }
  0x3e   :  { %p1217_p2 = por %p1216_p1, %p1215_p0 }
  0x40   :  { %p1218_p3 = pnand %p1217_p2, %p1211_p13 }
  0x42   :  { %1221 = shalt.err (!%p1218_p3)
}
  0x43   :  { %55 = dma.hbm_to_vmem [thread:$0]  %s1461_s3, 4096, %s1372_s17, [#allocation6], %s1276_s21, %s1276_s21, %s1277_s22  }
  0x44   :  { %s1280_s16 = smov [#allocation10]   ;;  %s1222_s23 = scalar_lea.hbm %s1465_s7, 2048 }
  0x45   :  { %s77_s18 = sshll.u32 %s1280_s16, 4  ;;  %p1223_p4 = scmp.ne.s32.totalorder %s1465_s7, %s1222_s23  ;;  %s78_s18 = int_to_ptr.vmem [resolvable:$true] %s77_s18 }
  0x46   :  { %p1226_p5 = scmp.lt.u32.totalorder %s1222_s23, %s1465_s7 }
  0x48   :  { %p1228_p6 = pnand %p1226_p5, %p1223_p4 }
  0x4a   :  { %1231 = shalt.err (!%p1228_p6)
}
  0x4b   :  { %s1232_s12 = scalar_lea.vmem %s78_s18, 2048  ;;  %p1237_p8 = scmp.lt.s32.totalorder %s78_s18, %s78_s18 }
  0x4c   :  { %p1233_p7 = scmp.ne.s32.totalorder %s78_s18, %s1232_s12  ;;  %p1238_p9 = scmp.lt.s32.totalorder %s1232_s12, %s1232_s12 }
  0x4e   :  { %p1239_p10 = por %p1238_p9, %p1237_p8 }
  0x50   :  { %p1240_p11 = pnand %p1239_p10, %p1233_p7 }
  0x52   :  { %1243 = shalt.err (!%p1240_p11)
}
  0x53   :  { %s1281_s3 = smov 64   ;;  %s1282_s17 = smov 4  }
  0x54   :  { %83 = dma.hbm_to_vmem [thread:$0]  %s1465_s7, 2048, %s78_s18, [#allocation9], %s1281_s3, %s1281_s3, %s1282_s17  }
  0x55   :  { %1266 = dma.done.wait [#allocation3], 256  }
  0x56   :  { %1267 = vsyncadd [#allocation3], 4294967040 }
  0x57   :  { %1268 = dma.done.wait [#allocation6], 4608  }
  0x58   :  { %1269 = vsyncadd [#allocation6], 4294962688 }
  0x59   :  { %1270 = dma.done.wait [#allocation9], 6144  }
  0x5a   :  { %1271 = vsyncadd [#allocation9], 4294961152  ;;  %v1283_v0 = vmov 0   ;;  %v1016_v1 = vld [vmem:[#allocation5 + $0x4] ss:$8 sps:$4 sm:$0xff]   ;;  %v102_v5 = vld [vmem:[#allocation2] sm:$0xff] }
  0x5b   :  { %177 = vmatprep.mubr.bf16.mxu0 %v1283_v0  ;;  %v1018_v2 = vld [vmem:[#allocation5] ss:$8 sps:$4 sm:$0xff]   ;;  %145 = vmatprep.subr.bf16.mxu0 %v1016_v1  ;;  %v1019_v3 = vld [vmem:[#allocation5 + $0x14] ss:$8 sps:$4 sm:$0xff]   ;;  %v1021_v4 = vld [vmem:[#allocation5 + $0x10] ss:$8 sps:$4 sm:$0xff]  }
  0x5c   :  { %146 = vmatpush1.bf16.msra.mxu0 %v1018_v2  ;;  %v103_v6 = vld [vmem:[#allocation2 + $0x8] sm:$0xff]  ;;  %v1022_v7 = vld [vmem:[#allocation7 + $0x4] ss:$8 sps:$4 sm:$0xff]   ;;  %v1024_v8 = vld [vmem:[#allocation7] ss:$8 sps:$4 sm:$0xff]   ;;  %vm141_vm0 = vcmask 261120  }
  0x5d   :  { %147 = vmatprep.subr.bf16.mxu0 %v1019_v3  ;;  %v1025_v9 = vld [vmem:[#allocation7 + $0x14] ss:$8 sps:$4 sm:$0xff]   ;;  %v104_v10 = vpack.c.bf16 %v103_v6, %v102_v5  ;;  %398 = vmatprep.subr.bf16.mxu1 %v1022_v7  ;;  %v1027_v11 = vld [vmem:[#allocation7 + $0x10] ss:$8 sps:$4 sm:$0xff]   ;;  %v1028_v12 = vld [vmem:[#allocation7 + $0x24] ss:$8 sps:$4 sm:$0xff]  }
  0x5e   :  { %399 = vmatpush1.bf16.msra.mxu1 %v1024_v8  ;;  %v1030_v13 = vld [vmem:[#allocation7 + $0x20] ss:$8 sps:$4 sm:$0xff]   ;;  %v1031_v14 = vld [vmem:[#allocation7 + $0x34] ss:$8 sps:$4 sm:$0xff]   ;;  %v1033_v15 = vld [vmem:[#allocation7 + $0x30] ss:$8 sps:$4 sm:$0xff]  }
  0x5f   :  { %400 = vmatprep.subr.bf16.mxu1 %v1025_v9  ;;  %v1034_v16 = vld [vmem:[#allocation7 + $0x44] ss:$8 sps:$4 sm:$0xff]   ;;  %v1036_v17 = vld [vmem:[#allocation7 + $0x40] ss:$8 sps:$4 sm:$0xff]   ;;  %v1037_v18 = vld [vmem:[#allocation7 + $0x54] ss:$8 sps:$4 sm:$0xff]  }
  0x60   :  { %148 = vmatpush1.bf16.msra.mxu0 %v1021_v4  ;;  %v1039_v19 = vld [vmem:[#allocation7 + $0x50] ss:$8 sps:$4 sm:$0xff]   ;;  %v1040_v20 = vld [vmem:[#allocation7 + $0x64] ss:$8 sps:$4 sm:$0xff]   ;;  %v1042_v21 = vld [vmem:[#allocation7 + $0x60] ss:$8 sps:$4 sm:$0xff]   ;;  %v111_v4 = vlaneseq }
  0x61   :  { %v1043_v22 = vld [vmem:[#allocation7 + $0x74] ss:$8 sps:$4 sm:$0xff]   ;;  %v1045_v23 = vld [vmem:[#allocation7 + $0x70] ss:$8 sps:$4 sm:$0xff]   ;;  %v1046_v24 = vld [vmem:[#allocation7 + $0x84] ss:$8 sps:$4 sm:$0xff]  }
  0x62   :  { %401 = vmatpush1.bf16.msra.mxu1 %v1027_v11  ;;  %v1048_v25 = vld [vmem:[#allocation7 + $0x80] ss:$8 sps:$4 sm:$0xff]   ;;  %v1049_v26 = vld [vmem:[#allocation7 + $0x94] ss:$8 sps:$4 sm:$0xff]   ;;  %v1051_v27 = vld [vmem:[#allocation7 + $0x90] ss:$8 sps:$4 sm:$0xff]  }
  0x63   :  { %901 = vmatmul.mubr.msk.bf16.vlgmr.msra.gmra.mrb[0].mxu0 %vm141_vm0, %v104_v10  ;;  %402 = vmatprep.subr.bf16.mxu1 %v1028_v12  ;;  %v1052_v28 = vld [vmem:[#allocation7 + $0xa4] ss:$8 sps:$4 sm:$0xff]   ;;  %v1054_v29 = vld [vmem:[#allocation7 + $0xa0] ss:$8 sps:$4 sm:$0xff]   ;;  %v1055_v30 = vld [vmem:[#allocation7 + $0xb4] ss:$8 sps:$4 sm:$0xff]  }
  0x64   :  { %v1057_v31 = vld [vmem:[#allocation7 + $0xb0] ss:$8 sps:$4 sm:$0xff]   ;;  %v1058_v32 = vld [vmem:[#allocation7 + $0xc4] ss:$8 sps:$4 sm:$0xff]   ;;  %v1060_v33 = vld [vmem:[#allocation7 + $0xc0] ss:$8 sps:$4 sm:$0xff]  }
  0x65   :  { %v1061_v34 = vld [vmem:[#allocation7 + $0xd4] ss:$8 sps:$4 sm:$0xff]   ;;  %v1063_v35 = vld [vmem:[#allocation7 + $0xd0] ss:$8 sps:$4 sm:$0xff]   ;;  %v1064_v36 = vld [vmem:[#allocation7 + $0xe4] ss:$8 sps:$4 sm:$0xff]  }
  0x66   :  { %403 = vmatpush1.bf16.msra.mxu1 %v1030_v13  ;;  %v1066_v37 = vld [vmem:[#allocation7 + $0xe0] ss:$8 sps:$4 sm:$0xff]   ;;  %v1067_v38 = vld [vmem:[#allocation7 + $0xf4] ss:$8 sps:$4 sm:$0xff]   ;;  %v1069_v39 = vld [vmem:[#allocation7 + $0xf0] ss:$8 sps:$4 sm:$0xff]  }
  0x67   :  { %404 = vmatprep.subr.bf16.mxu1 %v1031_v14  ;;  %v1070_v40 = vld [vmem:[#allocation8] ss:$8 sps:$4 sm:$0xff]   ;;  %v1072_v41 = vld [vmem:[#allocation8 + $0x4] ss:$8 sps:$4 sm:$0xff]   ;;  %v1075_v42 = vld [vmem:[#allocation8 + $0x14] ss:$8 sps:$4 sm:$0xff]  }
  0x68   :  { %651 = vmatprep.subr.bf16.mxu0 %v1072_v41  ;;  %v1073_v43 = vld [vmem:[#allocation8 + $0x10] ss:$8 sps:$4 sm:$0xff]   ;;  %v1078_v44 = vld [vmem:[#allocation8 + $0x24] ss:$8 sps:$4 sm:$0xff]   ;;  %v1076_v45 = vld [vmem:[#allocation8 + $0x20] ss:$8 sps:$4 sm:$0xff]  }
  0x69   :  { %652 = vmatpush1.bf16.msra.mxu0 %v1070_v40  ;;  %v1081_v46 = vld [vmem:[#allocation8 + $0x34] ss:$8 sps:$4 sm:$0xff]   ;;  %v1079_v47 = vld [vmem:[#allocation8 + $0x30] ss:$8 sps:$4 sm:$0xff]   ;;  %v1084_v48 = vld [vmem:[#allocation8 + $0x44] ss:$8 sps:$4 sm:$0xff]  }
  0x6a   :  { %405 = vmatpush1.bf16.msra.mxu1 %v1033_v15  ;;  %653 = vmatprep.subr.bf16.mxu0 %v1075_v42  ;;  %v1082_v49 = vld [vmem:[#allocation8 + $0x40] ss:$8 sps:$4 sm:$0xff]   ;;  %v1087_v50 = vld [vmem:[#allocation8 + $0x54] ss:$8 sps:$4 sm:$0xff]   ;;  %v1085_v51 = vld [vmem:[#allocation8 + $0x50] ss:$8 sps:$4 sm:$0xff]  }
  0x6b   :  { %406 = vmatprep.subr.bf16.mxu1 %v1034_v16  ;;  %v1090_v52 = vld [vmem:[#allocation8 + $0x64] ss:$8 sps:$4 sm:$0xff]   ;;  %v1088_v53 = vld [vmem:[#allocation8 + $0x60] ss:$8 sps:$4 sm:$0xff]   ;;  %v1093_v54 = vld [vmem:[#allocation8 + $0x74] ss:$8 sps:$4 sm:$0xff]  }
  0x6c   :  { %v1091_v55 = vld [vmem:[#allocation8 + $0x70] ss:$8 sps:$4 sm:$0xff]   ;;  %v1096_v56 = vld [vmem:[#allocation8 + $0x84] ss:$8 sps:$4 sm:$0xff]   ;;  %v1094_v57 = vld [vmem:[#allocation8 + $0x80] ss:$8 sps:$4 sm:$0xff]  }
  0x6d   :  { %654 = vmatpush1.bf16.msra.mxu0 %v1073_v43  ;;  %v1099_v58 = vld [vmem:[#allocation8 + $0x94] ss:$8 sps:$4 sm:$0xff]   ;;  %v1097_v59 = vld [vmem:[#allocation8 + $0x90] ss:$8 sps:$4 sm:$0xff]   ;;  %v1102_v60 = vld [vmem:[#allocation8 + $0xa4] ss:$8 sps:$4 sm:$0xff]  }
  0x6e   :  { %407 = vmatpush1.bf16.msra.mxu1 %v1036_v17  ;;  %655 = vmatprep.subr.bf16.mxu0 %v1078_v44  ;;  %v1100_v61 = vld [vmem:[#allocation8 + $0xa0] ss:$8 sps:$4 sm:$0xff]   ;;  %v1105_v62 = vld [vmem:[#allocation8 + $0xb4] ss:$8 sps:$4 sm:$0xff]   ;;  %v1103_v63 = vld [vmem:[#allocation8 + $0xb0] ss:$8 sps:$4 sm:$0xff]  }
  0x6f   :  { %408 = vmatprep.subr.bf16.mxu1 %v1037_v18  ;;  %v1108_v0 = vld [vmem:[#allocation8 + $0xc4] ss:$8 sps:$4 sm:$0xff]   ;;  %v1106_v1 = vld [vmem:[#allocation8 + $0xc0] ss:$8 sps:$4 sm:$0xff]   ;;  %v1111_v2 = vld [vmem:[#allocation8 + $0xd4] ss:$8 sps:$4 sm:$0xff]  }
  0x70   :  { %v1109_v3 = vld [vmem:[#allocation8 + $0xd0] ss:$8 sps:$4 sm:$0xff]   ;;  %v112_v5 = vshrl.u32 %v111_v4, 7  ;;  %s1284_s1 = smov [#allocation11]  }
  0x71   :  { %656 = vmatpush1.bf16.msra.mxu0 %v1076_v45  ;;  %v109_v7 = vld [vmem:[%s1460_s2] sm:$0x3]  ;;  %s883_s10 = sshll.u32 %s1284_s1, 4  ;;  %s884_s10 = int_to_ptr.vmem [resolvable:$true] %s883_s10 }
  0x72   :  { %409 = vmatpush1.bf16.msra.mxu1 %v1039_v19  ;;  %657 = vmatprep.subr.bf16.mxu0 %v1081_v46  ;;  %v1421_v6 = vsub.s32 0, %v112_v5  ;;  %v1426_v8 = vsub.s32 1, %v112_v5  ;;  %v226_v40 = vld [vmem:[%s1462_s4] sm:$0x3]  ;;  %s1244_s14 = scalar_lea.vmem %s884_s10, 256  ;;  %p1249_p13 = scmp.lt.s32.totalorder %s884_s10, %s884_s10 }
  0x73   :  { %410 = vmatprep.subr.bf16.mxu1 %v1040_v20  ;;  %p1245_p12 = scmp.ne.s32.totalorder %s884_s10, %s1244_s14  ;;  %p1250_p0 = scmp.lt.s32.totalorder %s1244_s14, %s1244_s14 }
  0x74   :  { %v114_v9 = vrot.slane %v109_v7, %v1421_v6  ;;  %v118_v10 = vrot.slane %v109_v7, %v1426_v8  ;;  %v231_v41 = vrot.slane %v226_v40, %v1421_v6  ;;  %v235_v42 = vrot.slane %v226_v40, %v1426_v8 }
  0x75   :  { %658 = vmatpush1.bf16.msra.mxu0 %v1079_v47  ;;  %p1251_p1 = por %p1250_p0, %p1249_p13 }
  0x76   :  { %411 = vmatpush1.bf16.msra.mxu1 %v1042_v21  ;;  %659 = vmatprep.subr.bf16.mxu0 %v1084_v48 }
  0x77   :  { %412 = vmatprep.subr.bf16.mxu1 %v1043_v22  ;;  %p1252_p2 = pnand %p1251_p1, %p1245_p12 }
  0x79   :  { %660 = vmatpush1.bf16.msra.mxu0 %v1082_v49 }
  0x7a   :  { %413 = vmatpush1.bf16.msra.mxu1 %v1045_v23  ;;  %661 = vmatprep.subr.bf16.mxu0 %v1087_v50 }
  0x7b   :  { %414 = vmatprep.subr.bf16.mxu1 %v1046_v24 }
  0x7d   :  { %662 = vmatpush1.bf16.msra.mxu0 %v1085_v51 }
  0x7e   :  { %415 = vmatpush1.bf16.msra.mxu1 %v1048_v25  ;;  %663 = vmatprep.subr.bf16.mxu0 %v1090_v52  ;;  %v1114_v25 = vld [vmem:[#allocation8 + $0xe4] ss:$8 sps:$4 sm:$0xff]  }
  0x7f   :  { %416 = vmatprep.subr.bf16.mxu1 %v1049_v26  ;;  %v1112_v26 = vld [vmem:[#allocation8 + $0xe0] ss:$8 sps:$4 sm:$0xff]  }
  0x81   :  { %664 = vmatpush1.bf16.msra.mxu0 %v1088_v53 }
  0x82   :  { %417 = vmatpush1.bf16.msra.mxu1 %v1051_v27  ;;  %665 = vmatprep.subr.bf16.mxu0 %v1093_v54  ;;  %v1117_v27 = vld [vmem:[#allocation8 + $0xf4] ss:$8 sps:$4 sm:$0xff]  }
  0x83   :  { %418 = vmatprep.subr.bf16.mxu1 %v1052_v28  ;;  %v1115_v28 = vld [vmem:[#allocation8 + $0xf0] ss:$8 sps:$4 sm:$0xff]  }
  0x85   :  { %666 = vmatpush1.bf16.msra.mxu0 %v1091_v55 }
  0x86   :  { %419 = vmatpush1.bf16.msra.mxu1 %v1054_v29  ;;  %667 = vmatprep.subr.bf16.mxu0 %v1096_v56  ;;  %v1118_v29 = vld [vmem:[#allocation10 + $0x40] sm:$0xff]  }
  0x87   :  { %420 = vmatprep.subr.bf16.mxu1 %v1055_v30  ;;  %v1119_v30 = vld [vmem:[#allocation10] sm:$0xff]  }
  0x89   :  { %668 = vmatpush1.bf16.msra.mxu0 %v1094_v57  ;;  %v1129_v57 = vld [vmem:[#allocation10 + $0x28] sm:$0xff]  }
  0x8a   :  { %421 = vmatpush1.bf16.msra.mxu1 %v1057_v31  ;;  %669 = vmatprep.subr.bf16.mxu0 %v1099_v58  ;;  %v1120_v31 = vld [vmem:[#allocation10 + $0x48] sm:$0xff]   ;;  %v1130_v58 = vld [vmem:[#allocation10 + $0x70] sm:$0xff]  }
  0x8b   :  { %422 = vmatprep.subr.bf16.mxu1 %v1058_v32  ;;  %v1121_v32 = vld [vmem:[#allocation10 + $0x8] sm:$0xff]  }
  0x8d   :  { %670 = vmatpush1.bf16.msra.mxu0 %v1097_v59  ;;  %v1131_v59 = vld [vmem:[#allocation10 + $0x30] sm:$0xff]  }
  0x8e   :  { %423 = vmatpush1.bf16.msra.mxu1 %v1060_v33  ;;  %671 = vmatprep.subr.bf16.mxu0 %v1102_v60  ;;  %v1122_v33 = vld [vmem:[#allocation10 + $0x50] sm:$0xff]   ;;  %v1132_v60 = vld [vmem:[#allocation10 + $0x78] sm:$0xff]  }
  0x8f   :  { %424 = vmatprep.subr.bf16.mxu1 %v1061_v34  ;;  %v1123_v34 = vld [vmem:[#allocation10 + $0x10] sm:$0xff]  }
  0x91   :  { %672 = vmatpush1.bf16.msra.mxu0 %v1100_v61  ;;  %v1133_v61 = vld [vmem:[#allocation10 + $0x38] sm:$0xff]  }
  0x92   :  { %425 = vmatpush1.bf16.msra.mxu1 %v1063_v35  ;;  %673 = vmatprep.subr.bf16.mxu0 %v1105_v62  ;;  %v1124_v35 = vld [vmem:[#allocation10 + $0x58] sm:$0xff]   ;;  %v479_v62 = vld [vmem:[%s1464_s6] sm:$0x3] }
  0x93   :  { %426 = vmatprep.subr.bf16.mxu1 %v1064_v36  ;;  %v1125_v36 = vld [vmem:[#allocation10 + $0x18] sm:$0xff]  }
  0x95   :  { %674 = vmatpush1.bf16.msra.mxu0 %v1103_v63  ;;  %v484_v63 = vrot.slane %v479_v62, %v1421_v6  ;;  %v966_v6 = vld [vmem:[%s1466_s8] ss:$0 sm:$0xff] }
  0x96   :  { %427 = vmatpush1.bf16.msra.mxu1 %v1066_v37  ;;  %675 = vmatprep.subr.bf16.mxu0 %v1108_v0  ;;  %v1126_v37 = vld [vmem:[#allocation10 + $0x60] sm:$0xff]   ;;  %v488_v0 = vrot.slane %v479_v62, %v1426_v8 }
  0x97   :  { %428 = vmatprep.subr.bf16.mxu1 %v1067_v38  ;;  %v1127_v38 = vld [vmem:[#allocation10 + $0x20] sm:$0xff]  }
  0x99   :  { %676 = vmatpush1.bf16.msra.mxu0 %v1106_v1 }
  0x9a   :  { %429 = vmatpush1.bf16.msra.mxu1 %v1069_v39  ;;  %677 = vmatprep.subr.bf16.mxu0 %v1111_v2  ;;  %v1128_v39 = vld [vmem:[#allocation10 + $0x68] sm:$0xff]  }
  0x9b   :  { %983 = vmatprep.subr.bf16.mxu1 %v1118_v29 }
  0x9d   :  { %678 = vmatpush1.bf16.msra.mxu0 %v1109_v3 }
  0x9e   :  { %679 = vmatprep.subr.bf16.mxu0 %v1114_v25 }
  0xa1   :  { %680 = vmatpush1.bf16.msra.mxu0 %v1112_v26 }
  0xa2   :  { %681 = vmatprep.subr.bf16.mxu0 %v1117_v27 }
  0xa5   :  { %682 = vmatpush1.bf16.msra.mxu0 %v1115_v28 }
 0x136   :  { %v179_v11 = vpop.f32.mrb[0].mxu0 }
 0x137   :  { %v180_v12 = vadd.f32 %v179_v11, %v114_v9  ;;  %v181_v13 = vpop.f32.mrb[1].mxu0 }
 0x138   :  { %v182_v14 = vadd.f32 %v181_v13, %v118_v10  ;;  %v183_v15 = vpop.f32.mrb[2].mxu0 }
 0x139   :  { %v184_v16 = vadd.f32 %v183_v15, %v114_v9  ;;  %v185_v17 = vpop.f32.mrb[3].mxu0  ;;  %v188_v19 = vmax.f32 %v180_v12, 0.0 }
 0x13a   :  { %v186_v18 = vadd.f32 %v185_v17, %v118_v10  ;;  %v189_v21 = vmax.f32 %v182_v14, 0.0 }
 0x13b   :  { %v190_v20 = vmax.f32 %v184_v16, 0.0 }
 0x13c   :  { %v191_v22 = vmax.f32 %v186_v18, 0.0 }
 0x13d   :  { %v192_v23 = vpack.c.bf16 %v190_v20, %v188_v19 }
 0x13e   :  { %v193_v24 = vpack.c.bf16 %v191_v22, %v189_v21 }
 0x140   :  { %430 = vmatprep.mubr.bf16.mxu1 %v193_v24 }
 0x141   :  { %431 = vmatmul.mubr.bf16.vlgmr.msra.gmra.mrb[0].mxu1 %v192_v23 }
 0x142   :  { %984 = vmatpush3.bf16.msra.mxu1 %v1119_v30 }
 0x143   :  { %985 = vmatprep.subr.bf16.mxu1 %v1120_v31 }
 0x146   :  { %986 = vmatpush3.bf16.msra.mxu1 %v1121_v32 }
 0x147   :  { %987 = vmatprep.subr.bf16.mxu1 %v1122_v33 }
 0x14a   :  { %988 = vmatpush3.bf16.msra.mxu1 %v1123_v34 }
 0x14b   :  { %989 = vmatprep.subr.bf16.mxu1 %v1124_v35 }
 0x14e   :  { %990 = vmatpush3.bf16.msra.mxu1 %v1125_v36 }
 0x14f   :  { %991 = vmatprep.subr.bf16.mxu1 %v1126_v37 }
 0x152   :  { %992 = vmatpush3.bf16.msra.mxu1 %v1127_v38 }
 0x153   :  { %993 = vmatprep.subr.bf16.mxu1 %v1128_v39 }
 0x156   :  { %994 = vmatpush3.bf16.msra.mxu1 %v1129_v57 }
 0x157   :  { %995 = vmatprep.subr.bf16.mxu1 %v1130_v58 }
 0x15a   :  { %996 = vmatpush3.bf16.msra.mxu1 %v1131_v59 }
 0x15b   :  { %997 = vmatprep.subr.bf16.mxu1 %v1132_v60 }
 0x15e   :  { %998 = vmatpush3.bf16.msra.mxu1 %v1133_v61 }
 0x214   :  { %v432_v43 = vpop.f32.mrb[0].mxu1 }
 0x215   :  { %v433_v44 = vadd.f32 %v432_v43, %v231_v41  ;;  %v434_v45 = vpop.f32.mrb[1].mxu1 }
 0x216   :  { %v435_v46 = vadd.f32 %v434_v45, %v235_v42  ;;  %v436_v47 = vpop.f32.mrb[2].mxu1 }
 0x217   :  { %v437_v48 = vadd.f32 %v436_v47, %v231_v41  ;;  %v438_v49 = vpop.f32.mrb[3].mxu1  ;;  %v441_v51 = vmax.f32 %v433_v44, 0.0 }
 0x218   :  { %v439_v50 = vadd.f32 %v438_v49, %v235_v42  ;;  %v442_v53 = vmax.f32 %v435_v46, 0.0 }
 0x219   :  { %v443_v52 = vmax.f32 %v437_v48, 0.0 }
 0x21a   :  { %v444_v54 = vmax.f32 %v439_v50, 0.0 }
 0x21b   :  { %v445_v55 = vpack.c.bf16 %v443_v52, %v441_v51 }
 0x21c   :  { %v446_v56 = vpack.c.bf16 %v444_v54, %v442_v53 }
 0x21e   :  { %683 = vmatprep.mubr.bf16.mxu0 %v446_v56 }
 0x21f   :  { %684 = vmatmul.mubr.bf16.vlgmr.msra.gmra.mrb[4].mxu0 %v445_v55 }
 0x2f2   :  { %v685_v1 = vpop.f32.mrb[4].mxu0 }
 0x2f3   :  { %v686_v2 = vadd.f32 %v685_v1, %v484_v63  ;;  %v687_v3 = vpop.f32.mrb[5].mxu0 }
 0x2f4   :  { %v688_v4 = vadd.f32 %v687_v3, %v488_v0  ;;  %v689_v5 = vpop.f32.mrb[6].mxu0 }
 0x2f5   :  { %v690_v7 = vadd.f32 %v689_v5, %v484_v63  ;;  %v691_v9 = vpop.f32.mrb[7].mxu0  ;;  %v694_v11 = vmax.f32 %v686_v2, 0.0 }
 0x2f6   :  { %v692_v10 = vadd.f32 %v691_v9, %v488_v0  ;;  %v695_v13 = vmax.f32 %v688_v4, 0.0 }
 0x2f7   :  { %v696_v12 = vmax.f32 %v690_v7, 0.0 }
 0x2f8   :  { %v697_v14 = vmax.f32 %v692_v10, 0.0 }
 0x2f9   :  { %v698_v15 = vpack.c.bf16 %v696_v12, %v694_v11 }
 0x2fa   :  { %v699_v16 = vpack.c.bf16 %v697_v14, %v695_v13 }
 0x2fc   :  { %867 = vmatprep.mubr.bf16.mxu1 %v699_v16 }
 0x2fd   :  { %868 = vmatmul.mubr.bf16.vlgmr.msra.gmra.mrb[4].mxu1 %v698_v15 }
 0x3d0   :  { %v999_v17 = vpop.f32.mrb[4].mxu1 }
 0x3d1   :  { %v1000_v8 = vpop.f32.mrb[5].mxu1 }
 0x3d2   :  { %v1001_v18 = vadd.f32 %v1000_v8, %v999_v17  ;;  %v1002_v19 = vpop.f32.mrb[6].mxu1 }
 0x3d3   :  { %v1003_v20 = vpop.f32.mrb[7].mxu1 }
 0x3d4   :  { %v870_v21 = vadd.f32 %v1001_v18, %v966_v6  ;;  %v1004_v22 = vadd.f32 %v1003_v20, %v1002_v19 }
 0x3d6   :  { %876 = vst [vmem:[#allocation11] sm:$0xff] %v870_v21  ;;  %v873_v23 = vadd.f32 %v1004_v22, %v966_v6 }
 0x3d8   :  { %877 = vst [vmem:[#allocation11 + $0x8] sm:$0xff] %v873_v23 }
 0x3d9   :  { %1255 = shalt.err (!%p1252_p2)
}
 0x3da   :  { %s1256_s15 = scalar_lea.hbm %s1467_s9, 256 }
 0x3db   :  { %p1257_p3 = scmp.ne.s32.totalorder %s1467_s9, %s1256_s15  ;;  %p1260_p4 = scmp.lt.u32.totalorder %s1256_s15, %s1467_s9 }
 0x3dd   :  { %p1262_p5 = pnand %p1260_p4, %p1257_p3 }
 0x3df   :  { %1265 = shalt.err (!%p1262_p5)
}
 0x3e0   :  { %889 = dma.vmem_to_hbm [thread:$0]  %s884_s10, 256, %s1467_s9, [#allocation4], %s1276_s21, %s1276_s21, %s1277_s22  }
 0x3e1   :  { %1272 = dma.done.wait [#allocation4], 256  }
 0x3e2   :  { %1273 = vsyncadd [#allocation4], 4294967040 }
 0x3e3   :  { %893 = vsyncpa [#allocation3], 1 }
 0x3e4   :  { %894 = vsyncpa [#allocation6], 1 }
 0x3e5   :  { %895 = vsyncpa [#allocation9], 1 }
 0x3e6   :  { %896 = vsyncpa [#allocation4], 1 }

</bundles_post_ra>
